<compile_context>
chip_gen: v7x
topology: tpu7x:2x2x1
jax: 0.10.0
libtpu: 0.0.40
codegen_flags: <defaults>
</compile_context>

<pallas_src>
import functools

import numpy as np

import jax
import jax.numpy as jnp
from jax.experimental import pallas as pl
from jax.experimental.pallas import tpu as pltpu

NEG_SLOPE = 0.1  # LeakyReLU slope from conv_block(act='leaky')


def _round_up(x, m):
    return (x + m - 1) // m * m


# ---------------------------------------------------------------------------
# One-time self-calibration of the hardware rotate direction (guards against
# pltpu.roll rotation-convention differences across jax versions).  Must be
# executed eagerly at least once before tracing (prepare_cmp_params does it).
# ---------------------------------------------------------------------------
@functools.lru_cache(maxsize=None)
def _roll_matches_numpy():
    def k(x_ref, o_ref):
        o_ref[...] = pltpu.roll(x_ref[...], 1, axis=1)

    x = jnp.arange(8 * 128, dtype=jnp.float32).reshape(8, 128)
    out = pl.pallas_call(
        k, out_shape=jax.ShapeDtypeStruct((8, 128), jnp.float32))(x)
    if bool(out[0, 0] == x[0, 127]):
        return True          # same convention as np.roll
    if bool(out[0, 0] == x[0, 1]):
        return False         # opposite convention
    raise RuntimeError("unexpected pltpu.roll behavior")


def _rot_shift(np_shift, length):
    """Hardware roll amount equivalent to np.roll(x, np_shift) on this TPU."""
    s = np_shift % length
    return s if _roll_matches_numpy() else (length - s) % length


# ---------------------------------------------------------------------------
# Static helpers (trace-time constants).
# ---------------------------------------------------------------------------
def _tap_masks(h, w, v):
    """[9, v*h*w] border masks; lane order is (vertex, row, col)."""
    m = np.zeros((9, h * w), np.float32)
    ii, jj = np.meshgrid(np.arange(h), np.arange(w), indexing="ij")
    t = 0
    for dh in (-1, 0, 1):
        for dw in (-1, 0, 1):
            valid = ((ii + dh >= 0) & (ii + dh < h) &
                     (jj + dw >= 0) & (jj + dw < w))
            m[t] = valid.reshape(-1).astype(np.float32)
            t += 1
    return np.tile(m, (1, v))


def _build_adjacency(edges, num_v):
    """Dense symmetric +/- adjacency from the (src, sign, dst) edge list."""
    e = edges.reshape(-1, 3)
    src = e[:, 0].astype(jnp.int32)
    dst = e[:, 2].astype(jnp.int32)
    sign = e[:, 1]
    oh_src = jax.nn.one_hot(src, num_v, dtype=jnp.float32)   # [E, V]
    oh_dst = jax.nn.one_hot(dst, num_v, dtype=jnp.float32)

    def sym_adj(wgt):
        wgt = wgt[:, None]
        # pooled[dst] += feats[src] and pooled[src] += feats[dst]
        return oh_dst.T @ (oh_src * wgt) + oh_src.T @ (oh_dst * wgt)

    a_pos = sym_adj((sign > 0).astype(jnp.float32))
    a_neg = sym_adj((sign < 0).astype(jnp.float32))
    return a_pos, a_neg


# ---------------------------------------------------------------------------
# Fused Pallas kernel: pooling + concat + 3x (3x3 conv + bias + LeakyReLU).
# ---------------------------------------------------------------------------
def _cmp_fused_kernel(x_ref, cpos_ref, cneg_ref, mask_ref,
                      w1_ref, b1_ref, w2_ref, b2_ref, w3_ref, b3_ref,
                      out_ref, act_a, act_b, tap_ref,
                      *, num_v, hw, img_w, gp, c_mid):
    L = num_v * hw

    def conv_layer(act, rows_in, w_ref, b_ref):
        # act: [rows_in, L] f32 (channel-major, lanes = (vertex, row, col)).
        # Build the stacked-tap operand in VMEM, then ONE MXU matmul with
        # contraction depth 9*rows_in, then bias + LeakyReLU epilogue.
        t = 0
        for dh in (-1, 0, 1):
            for dw in (-1, 0, 1):
                off = dh * img_w + dw
                s = _rot_shift(-off, L)
                shifted = act if s == 0 else pltpu.roll(act, s, axis=1)
                tap_ref[pl.ds(t * rows_in, rows_in), :] = (
                    shifted * mask_ref[pl.ds(t, 1), :])
                t += 1
        y = jnp.dot(w_ref[...], tap_ref[pl.ds(0, 9 * rows_in), :],
                    preferred_element_type=jnp.float32)        # [cout, L]
        y = y + b_ref[...]                                     # [cout, 1]
        return jnp.where(y > 0.0, y, NEG_SLOPE * y)            # LeakyReLU

    # ---- edge pooling: pooled[v] = sum_u A[v,u] x[u], as V lane-block
    #      rotations of the vertex-fused lane axis weighted by coeff planes.
    x = x_ref[...]                                             # [gp, L]
    pos = x * cpos_ref[pl.ds(0, 1), :]
    neg = x * cneg_ref[pl.ds(0, 1), :]
    for d in range(1, num_v):
        s = _rot_shift(-d * hw, L)
        xd = pltpu.roll(x, s, axis=1)
        pos = pos + xd * cpos_ref[pl.ds(d, 1), :]
        neg = neg + xd * cneg_ref[pl.ds(d, 1), :]

    # enc_in = concat([feats, pooled_pos, pooled_neg], channel axis)
    act_a[pl.ds(0, gp), :] = x
    act_a[pl.ds(gp, gp), :] = pos
    act_a[pl.ds(2 * gp, gp), :] = neg

    # ---- encoder: 3 x (3x3 conv s1 p1 + bias + LeakyReLU), all in VMEM ----
    act_b[...] = conv_layer(act_a[...], 3 * gp, w1_ref, b1_ref)
    act_a[pl.ds(0, c_mid), :] = conv_layer(act_b[...], c_mid, w2_ref, b2_ref)
    out_ref[...] = conv_layer(act_a[pl.ds(0, c_mid), :], c_mid,
                              w3_ref, b3_ref)


def cmp_forward(feats, edges, prep):
    # feats: [V, C, H, W]; edges: [E, 3] = (src, sign, dst) -> out [V, C, H, W]
    v, c, h, w = feats.shape
    hw = h * w
    L = v * hw
    gp = _round_up(c, 8)
    assert (2 * c) % 8 == 0, "hidden width 2*C must be a multiple of 8"
    assert L % 128 == 0, "V*H*W must be a multiple of 128 lanes"

    w1p, b1, w2p, b2, w3p, b3 = prep

    # channel-major, vertex-fused activation: [C_pad, V*H*W]
    x_cm = jnp.transpose(feats.astype(jnp.float32), (1, 0, 2, 3)).reshape(c, L)
    x_cm = jnp.pad(x_cm, ((0, gp - c), (0, 0)))

    # dense adjacency + per-rotation coefficient planes (tiny XLA glue)
    a_pos, a_neg = _build_adjacency(edges, v)
    d_idx = (jnp.arange(v)[None, :] + jnp.arange(v)[:, None]) % v   # [d, v]
    v_idx = jnp.broadcast_to(jnp.arange(v)[None, :], (v, v))
    cpos = jnp.repeat(a_pos[v_idx, d_idx], hw, axis=1)              # [V, L]
    cneg = jnp.repeat(a_neg[v_idx, d_idx], hw, axis=1)

    masks = jnp.asarray(_tap_masks(h, w, v))                        # [9, L]

    kernel = functools.partial(_cmp_fused_kernel, num_v=v, hw=hw, img_w=w,
                               gp=gp, c_mid=2 * c)
    vspec = pl.BlockSpec(memory_space=pltpu.MemorySpace.VMEM)
    out_cm = pl.pallas_call(
        kernel,
        out_shape=jax.ShapeDtypeStruct((c, L), jnp.float32),
        in_specs=[vspec] * 10,
        out_specs=vspec,
        scratch_shapes=[
            pltpu.VMEM((3 * gp, L), jnp.float32),       # act_a (enc_in / ping)
            pltpu.VMEM((2 * c, L), jnp.float32),        # act_b (pong)
            pltpu.VMEM((9 * 3 * gp, L), jnp.float32),   # stacked-tap operand
        ],
    )(x_cm, cpos, cneg, masks, w1p, b1, w2p, b2, w3p, b3)

    return jnp.transpose(out_cm.reshape(c, v, h, w), (1, 0, 2, 3))


# ---------------------------------------------------------------------------
# Parameter init + one-time repacking to the kernel layout.
# ---------------------------------------------------------------------------
def init_cmp_params(key, in_channels):
    # Encoder: Conv(3C->2C), Conv(2C->2C), Conv(2C->C), each 3x3 s1 p1.
    c = in_channels
    dims = [(3 * c, 2 * c), (2 * c, 2 * c), (2 * c, c)]
    params = []
    for k, (cin, cout) in zip(jax.random.split(key, len(dims)), dims):
        kw, kb = jax.random.split(k)
        bound = 1.0 / np.sqrt(9 * cin)
        wgt = jax.random.uniform(kw, (cout, cin, 3, 3), jnp.float32,
                                 -bound, bound)
        bia = jax.random.uniform(kb, (cout,), jnp.float32, -bound, bound)
        params.append((wgt, bia))
    return params


def prepare_cmp_params(params, in_channels):
    """Hoisted, one-time weight/bias repacking to the fused-kernel layout."""
    _roll_matches_numpy()       # run the eager roll-direction probe once
    c = in_channels
    gp = _round_up(c, 8)
    (w1, b1), (w2, b2), (w3, b3) = params

    def prep(wgt, groups, rows_in):
        cout = wgt.shape[0]
        wt = jnp.zeros((cout, 9, rows_in), jnp.float32)
        for row_off, n_ch, ch_off in groups:
            blk = jnp.transpose(wgt[:, ch_off:ch_off + n_ch], (0, 2, 3, 1))
            wt = wt.at[:, :, row_off:row_off + n_ch].set(
                blk.reshape(cout, 9, n_ch))
        return wt.reshape(cout, 9 * rows_in)

    w1p = prep(w1, [(0, c, 0), (gp, c, c), (2 * gp, c, 2 * c)], 3 * gp)
    w2p = prep(w2, [(0, 2 * c, 0)], 2 * c)
    w3p = prep(w3, [(0, 2 * c, 0)], 2 * c)
    return (w1p, b1.reshape(-1, 1).astype(jnp.float32),
            w2p, b2.reshape(-1, 1).astype(jnp.float32),
            w3p, b3.reshape(-1, 1).astype(jnp.float32))


# ---------------------------------------------------------------------------
# Pure-JAX reference (scatter_add + lax.conv) for the numerical self-check.
# ---------------------------------------------------------------------------
def cmp_reference(feats, edges, params):
    e = edges.reshape(-1, 3)
    src = e[:, 0].astype(jnp.int32)
    dst = e[:, 2].astype(jnp.int32)
    pos = (e[:, 1] > 0)[:, None, None, None]
    neg = (e[:, 1] < 0)[:, None, None, None]
    zeros = jnp.zeros_like(feats)
    pooled_pos = zeros.at[dst].add(jnp.where(pos, feats[src], 0.0))
    pooled_pos = pooled_pos.at[src].add(jnp.where(pos, feats[dst], 0.0))
    pooled_neg = zeros.at[dst].add(jnp.where(neg, feats[src], 0.0))
    pooled_neg = pooled_neg.at[src].add(jnp.where(neg, feats[dst], 0.0))
    x = jnp.concatenate([feats, pooled_pos, pooled_neg], axis=1)
    for wgt, bia in params:
        x = jax.lax.conv_general_dilated(
            x, wgt, window_strides=(1, 1), padding=((1, 1), (1, 1)),
            dimension_numbers=("NCHW", "OIHW", "NCHW"),
            precision=jax.lax.Precision.HIGHEST)
        x = x + bia[None, :, None, None]
        x = jnp.where(x > 0, x, NEG_SLOPE * x)
    return x


if __name__ == "__main__":
    V, C, H, W, E = 8, 4, 16, 16, 12

    key = jax.random.PRNGKey(0)
    k_f, k_s, k_d, k_sgn, k_p = jax.random.split(key, 5)
    feats = jax.random.normal(k_f, (V, C, H, W), jnp.float32)
    src = jax.random.randint(k_s, (E,), 0, V)
    dst = jax.random.randint(k_d, (E,), 0, V)
    sign = jax.random.randint(k_sgn, (E,), -1, 2)     # values in {-1, 0, 1}
    edges = jnp.stack([src, sign, dst], axis=1).astype(jnp.int32)

    params = init_cmp_params(k_p, C)
    prep = prepare_cmp_params(params, C)   # hoisted weight repack (+ probe)

    fwd = jax.jit(lambda f, e: cmp_forward(f, e, prep))
    out = fwd(feats, edges)
    jax.block_until_ready(out)

    assert out.shape == (V, C, H, W), out.shape
    assert bool(jnp.all(jnp.isfinite(out)))

    ref = cmp_reference(feats, edges, params)
    max_err = float(jnp.max(jnp.abs(out - ref)))
    assert max_err < 3e-2, f"mismatch vs reference: max abs err {max_err}"
    print("KERNEL_OK")
</pallas_src>

<mosaic_0001>
module attributes {stable_mosaic.version = 11 : i64} {
  func.func @k(%arg0: memref<8x128xf32, #tpu.memory_space<vmem>>, %arg1: memref<8x128xf32, #tpu.memory_space<vmem>>) attributes {dimension_semantics = [], scalar_prefetch = 0 : i64, scratch_operands = 0 : i64, tpu.core_type = #tpu.core_type<tc>} {
    %c0 = arith.constant 0 : index
    %c0_0 = arith.constant 0 : index
    %0 = vector.load %arg0[%c0, %c0_0] : memref<8x128xf32, #tpu.memory_space<vmem>>, vector<8x128xf32>
    %c1_i32 = arith.constant 1 : i32
    %1 = tpu.dynamic_rotate %0 by %c1_i32 dim 1 : vector<8x128xf32>, i32 -> vector<8x128xf32>
    %c0_1 = arith.constant 0 : index
    %c0_2 = arith.constant 0 : index
    %2 = vector.load %arg1[%c0_1, %c0_2] : memref<8x128xf32, #tpu.memory_space<vmem>>, vector<8x128xf32>
    tpu.vector_store %arg1[%c0_1, %c0_2], %1 {strides = array<i32>} : memref<8x128xf32, #tpu.memory_space<vmem>>, vector<8x128xf32>,
    return
  }
}

</mosaic_0001>

<bundles_post_ra>
// kernel: tpu_custom_call.1
= control target key start
LH: loop header
LB: loop body
LE: loop exit
PB: predicated region body
PF: predicated region fallthrough
CT: control target
= control target key end

     0   :  { %6 = vsyncpa [#allocation3], 0  ;;  %s128_s0 = inlined_call_operand.hbm [shape: f32[8,128], index: 0, kind: input, shape index: {}]   ;;  %s129_s1 = inlined_call_operand.hbm [shape: f32[8,128], index: 1, kind: output, shape index: {}]  }
   0x1   :  { %7 = vsyncpa [#allocation4], 0  ;;  %s91_s6 = smov [#allocation2]   ;;  %s43_s10 = scalar_lea.hbm %s128_s0, 128 }
   0x2   :  { %s14_s7 = sshll.u32 %s91_s6, 4  ;;  %p44_p0 = scmp.ne.s32.totalorder %s128_s0, %s43_s10  ;;  %s15_s7 = int_to_ptr.vmem [resolvable:$true] %s14_s7 }
   0x3   :  { %p47_p1 = scmp.lt.u32.totalorder %s43_s10, %s128_s0 }
   0x5   :  { %p49_p2 = pnand %p47_p1, %p44_p0 }
   0x7   :  { %52 = shalt.err (!%p49_p2)
}
   0x8   :  { %s53_s15 = scalar_lea.vmem %s15_s7, 128  ;;  %p58_p4 = scmp.lt.s32.totalorder %s15_s7, %s15_s7 }
   0x9   :  { %p54_p3 = scmp.ne.s32.totalorder %s15_s7, %s53_s15  ;;  %p59_p5 = scmp.lt.s32.totalorder %s53_s15, %s53_s15 }
   0xb   :  { %p60_p6 = por %p59_p5, %p58_p4 }
   0xd   :  { %p61_p7 = pnand %p60_p6, %p54_p3 }
   0xf   :  { %64 = shalt.err (!%p61_p7)
}
  0x10   :  { %17 = dma.hbm_to_vmem [thread:$0]  %s128_s0, 128, %s15_s7, [#allocation3]  }
  0x11   :  { %87 = dma.done.wait [#allocation3], 128  }
  0x12   :  { %88 = vsyncadd [#allocation3], 4294967168  ;;  %v21_v0 = vld [vmem:[#allocation2] sm:$0xff]  ;;  %s92_s18 = smov 1   ;;  %s93_s19 = smov [#allocation5]  }
  0x13   :  { %22 = vrot.lane.b32.xlu0 %v21_v0, %s92_s18  ;;  %s31_s20 = sshll.u32 %s93_s19, 4  ;;  %s32_s20 = int_to_ptr.vmem [resolvable:$true] %s31_s20 }
  0x14   :  { %s65_s21 = scalar_lea.vmem %s32_s20, 128  ;;  %p70_p9 = scmp.lt.s32.totalorder %s32_s20, %s32_s20 }
  0x15   :  { %p66_p8 = scmp.ne.s32.totalorder %s32_s20, %s65_s21  ;;  %p71_p10 = scmp.lt.s32.totalorder %s65_s21, %s65_s21 }
  0x17   :  { %p72_p11 = por %p71_p10, %p70_p9 }
  0x19   :  { %p73_p12 = pnand %p72_p11, %p66_p8 }
  0x85   :  { %v23_v1 = vpop.permute.xlu0 %22 }
  0x86   :  { %24 = vst [vmem:[#allocation5] sm:$0xff] %v23_v1 }
  0x87   :  { %76 = shalt.err (!%p73_p12)
}
  0x88   :  { %s77_s0 = scalar_lea.hbm %s129_s1, 128 }
  0x89   :  { %p78_p13 = scmp.ne.s32.totalorder %s129_s1, %s77_s0  ;;  %p81_p0 = scmp.lt.u32.totalorder %s77_s0, %s129_s1 }
  0x8b   :  { %p83_p1 = pnand %p81_p0, %p78_p13 }
  0x8d   :  { %86 = shalt.err (!%p83_p1)
}
  0x8e   :  { %34 = dma.vmem_to_hbm [thread:$0]  %s32_s20, 128, %s129_s1, [#allocation4]  }
  0x8f   :  { %89 = dma.done.wait [#allocation4], 128  }
  0x90   :  { %90 = vsyncadd [#allocation4], 4294967168 }
  0x91   :  { %38 = vsyncpa [#allocation3], 1 }
  0x92   :  { %39 = vsyncpa [#allocation4], 1 }

</bundles_post_ra>
